<compile_context>
chip_gen: v7x
topology: tpu7x:2x2x1
jax: 0.10.0
libtpu: 0.0.40
codegen_flags: <defaults>
</compile_context>

<pallas_src>
import functools

import jax
import jax.numpy as jnp
from jax import lax
from jax.experimental import pallas as pl
from jax.experimental.pallas import tpu as pltpu


_NEG_SLOPE = 0.01


def _leaky_relu(v):
    return jnp.where(v >= 0, v, _NEG_SLOPE * v)


def _round_up(n, m):
    return (n + m - 1) // m * m


def _choose_tiles(batch, block_batch):
    """Pick (batch_tile, sub_chunk, n_blocks); all Python ints."""
    sub_target = 256
    tb = _round_up(min(block_batch, max(batch, 1)), 128)
    if batch > 128:
        # v7x: make sure there are at least 2 grid blocks so the "parallel"
        # grid axis can feed both TensorCores (harmless on v5e/v6e).
        tb = min(tb, _round_up(pl.cdiv(batch, 2), 128))
    sub = min(sub_target, tb)
    tb = _round_up(tb, sub)          # so the in-kernel sub-chunk loop is exact
    n_blocks = pl.cdiv(batch, tb)
    return tb, sub, n_blocks


def xmor_kernel(x_ref,
                w0_ref, b0_ref,
                w1_ref, b1_ref,
                w2_ref, b2_ref,
                w3_ref, b3_ref,
                out_ref, *, sub):
    f32 = jnp.float32
    # Weights/biases are VMEM-resident (constant index_map); hoist the loads
    # (and the one-time up-cast to f32) out of the sub-chunk loop.
    w0 = w0_ref[...].astype(f32)
    w1 = w1_ref[...].astype(f32)
    w2 = w2_ref[...].astype(f32)
    w3 = w3_ref[...].astype(f32)
    b0 = b0_ref[...]
    b1 = b1_ref[...]
    b2 = b2_ref[...]
    b3 = b3_ref[...]

    n_sub = x_ref.shape[0] // sub    # static

    def body(j, carry):
        off = pl.multiple_of(j * sub, sub)
        # (sub, x_dim) slab of the input tile, batch on the sublane axis.
        xc = x_ref[pl.ds(off, sub), :].astype(f32)
        # Layer 0: contract dim 1 of W0 (out, in) with dim 1 of xc (sub, in)
        # -> (hidden, sub): activations are (features, batch) from here on.
        h = lax.dot_general(w0, xc, (((1,), (1,)), ((), ())),
                            preferred_element_type=f32) + b0
        h = _leaky_relu(h)
        h = _leaky_relu(jnp.dot(w1, h, preferred_element_type=f32) + b1)
        h = _leaky_relu(jnp.dot(w2, h, preferred_element_type=f32) + b2)
        y = _leaky_relu(jnp.dot(w3, h, preferred_element_type=f32) + b3)
        out_ref[:, pl.ds(off, sub)] = y.astype(out_ref.dtype)
        return carry

    lax.fori_loop(0, n_sub, body, 0)


@functools.partial(jax.jit,
                   static_argnames=("block_batch", "io_dtype",
                                    "transpose_output"))
def xmor_forward(x, params, *, block_batch=8192, io_dtype=jnp.float32,
                 transpose_output=True):
    """x: (batch, x_dim).  params: list of (W, b), W:(out, in), b:(out, 1).

    Returns (batch, x_rom_dim) in io_dtype (or (x_rom_dim, batch) if
    transpose_output=False, which skips one small HBM pass).
    """
    (w0, b0), (w1, b1), (w2, b2), (w3, b3) = params
    batch, x_dim = x.shape
    x_rom_dim = w3.shape[0]

    tb, sub, n_blocks = _choose_tiles(batch, block_batch)

    x_io = x.astype(io_dtype)                       # no transpose, no pad
    weights = [w.astype(io_dtype) for w in (w0, w1, w2, w3)]
    biases = [b.astype(jnp.float32) for b in (b0, b1, b2, b3)]

    const2 = lambda i: (0, 0)
    in_specs = [pl.BlockSpec((tb, x_dim), lambda i: (i, 0))]
    for w, b in zip(weights, biases):
        in_specs.append(pl.BlockSpec(w.shape, const2))  # resident across grid
        in_specs.append(pl.BlockSpec(b.shape, const2))  # resident across grid

    out_t = pl.pallas_call(
        functools.partial(xmor_kernel, sub=sub),
        out_shape=jax.ShapeDtypeStruct((x_rom_dim, batch), io_dtype),
        grid=(n_blocks,),
        in_specs=in_specs,
        out_specs=pl.BlockSpec((x_rom_dim, tb), lambda i: (0, i)),
        compiler_params=pltpu.CompilerParams(
            dimension_semantics=("parallel",),
            vmem_limit_bytes=32 * 1024 * 1024),
    )(x_io, weights[0], biases[0], weights[1], biases[1],
      weights[2], biases[2], weights[3], biases[3])

    return out_t.T if transpose_output else out_t


def init_params(key, x_dim, x_rom_dim=3):
    """Init mirroring the PyTorch module.

    Weights: kaiming_uniform_ (a=0) as the module explicitly calls, stored in
    PyTorch (out, in) layout.  Biases: nn.Linear default
    uniform(-1/sqrt(fan_in), 1/sqrt(fan_in)), stored as (out, 1).
    """
    hidden = (x_dim + x_rom_dim) // 2
    dims = [(hidden, x_dim), (hidden, hidden), (hidden, hidden),
            (x_rom_dim, hidden)]
    params = []
    for (fan_out, fan_in) in dims:
        key, kw, kb = jax.random.split(key, 3)
        w_bound = jnp.sqrt(6.0 / fan_in)          # kaiming_uniform, a=0
        b_bound = 1.0 / jnp.sqrt(float(fan_in))   # nn.Linear default bias init
        w = jax.random.uniform(kw, (fan_out, fan_in), jnp.float32,
                               minval=-w_bound, maxval=w_bound)
        b = jax.random.uniform(kb, (fan_out, 1), jnp.float32,
                               minval=-b_bound, maxval=b_bound)
        params.append((w, b))
    return params


def xmor_reference(x, params):
    """Pure-JAX reference of the PyTorch forward pass ((batch, feat) layout)."""
    h = x
    for (w, b) in params:
        h = jax.nn.leaky_relu(h @ w.T + b[:, 0], negative_slope=0.01)
    return h


if __name__ == "__main__":
    x_dim = 16        # full-order state dimension
    x_rom_dim = 3     # reduced-order state dimension (module default)

    key = jax.random.PRNGKey(0)
    key, kx_small, kx_big = jax.random.split(key, 3)
    params = init_params(key, x_dim, x_rom_dim)

    # --- Small batch (single ragged block, single sub-chunk), f32 I/O. ---
    batch = 8
    x = jax.random.normal(kx_small, (batch, x_dim), dtype=jnp.float32)
    ref = xmor_reference(x, params)
    out = jax.block_until_ready(xmor_forward(x, params))
    assert out.shape == (batch, x_rom_dim)
    assert jnp.allclose(out, ref, atol=1e-5, rtol=1e-5), "f32 mismatch (small)"

    # --- Larger batch: 2 grid blocks, multi-sub-chunk loop, ragged edge. ---
    batch_big = 1030
    xb = jax.random.normal(kx_big, (batch_big, x_dim), dtype=jnp.float32)
    refb = xmor_reference(xb, params)
    outb = jax.block_until_ready(xmor_forward(xb, params))
    assert outb.shape == (batch_big, x_rom_dim)
    assert jnp.allclose(outb, refb, atol=1e-5, rtol=1e-5), "f32 mismatch (big)"

    # --- bf16 I/O path (HBM-bandwidth win on all generations; compute stays
    #     f32 in-kernel, so only the x/W/y HBM round-trips are quantized). ---
    out_bf16 = jax.block_until_ready(
        xmor_forward(xb, params, io_dtype=jnp.bfloat16))
    assert out_bf16.shape == (batch_big, x_rom_dim)
    assert out_bf16.dtype == jnp.bfloat16
    assert jnp.allclose(out_bf16.astype(jnp.float32), refb,
                        atol=5e-2, rtol=5e-2), "bf16 mismatch vs reference"

    print("KERNEL_OK")
</pallas_src>

<mosaic_0001>
module attributes {stable_mosaic.version = 11 : i64} {
  func.func @xmor_kernel(%arg0: i32, %arg1: memref<128x16xf32, #tpu.memory_space<vmem>>, %arg2: memref<9x16xf32, #tpu.memory_space<vmem>>, %arg3: memref<9x1xf32, #tpu.memory_space<vmem>>, %arg4: memref<9x9xf32, #tpu.memory_space<vmem>>, %arg5: memref<9x1xf32, #tpu.memory_space<vmem>>, %arg6: memref<9x9xf32, #tpu.memory_space<vmem>>, %arg7: memref<9x1xf32, #tpu.memory_space<vmem>>, %arg8: memref<3x9xf32, #tpu.memory_space<vmem>>, %arg9: memref<3x1xf32, #tpu.memory_space<vmem>>, %arg10: memref<3x128xf32, #tpu.memory_space<vmem>>) attributes {dimension_semantics = [#tpu.dimension_semantics<parallel>], iteration_bounds = array<i64: 1>, scalar_prefetch = 0 : i64, scratch_operands = 0 : i64, tpu.core_type = #tpu.core_type<tc>, window_params = [{transform_indices = @transform_0, window_bounds = array<i64: 128, 16>}, {pipeline_mode = #tpu.pipeline_mode<synchronous>, transform_indices = @transform_1, window_bounds = array<i64: 9, 16>}, {pipeline_mode = #tpu.pipeline_mode<synchronous>, transform_indices = @transform_2, window_bounds = array<i64: 9, 1>}, {pipeline_mode = #tpu.pipeline_mode<synchronous>, transform_indices = @transform_3, window_bounds = array<i64: 9, 9>}, {pipeline_mode = #tpu.pipeline_mode<synchronous>, transform_indices = @transform_4, window_bounds = array<i64: 9, 1>}, {pipeline_mode = #tpu.pipeline_mode<synchronous>, transform_indices = @transform_5, window_bounds = array<i64: 9, 9>}, {pipeline_mode = #tpu.pipeline_mode<synchronous>, transform_indices = @transform_6, window_bounds = array<i64: 9, 1>}, {pipeline_mode = #tpu.pipeline_mode<synchronous>, transform_indices = @transform_7, window_bounds = array<i64: 3, 9>}, {pipeline_mode = #tpu.pipeline_mode<synchronous>, transform_indices = @transform_8, window_bounds = array<i64: 3, 1>}, {transform_indices = @transform_9, window_bounds = array<i64: 3, 128>}]} {
    %c0 = arith.constant 0 : index
    %c0_0 = arith.constant 0 : index
    %0 = vector.load %arg2[%c0, %c0_0] : memref<9x16xf32, #tpu.memory_space<vmem>>, vector<9x16xf32>
    %c0_1 = arith.constant 0 : index
    %c0_2 = arith.constant 0 : index
    %1 = vector.load %arg4[%c0_1, %c0_2] : memref<9x9xf32, #tpu.memory_space<vmem>>, vector<9x9xf32>
    %c0_3 = arith.constant 0 : index
    %c0_4 = arith.constant 0 : index
    %2 = vector.load %arg6[%c0_3, %c0_4] : memref<9x9xf32, #tpu.memory_space<vmem>>, vector<9x9xf32>
    %c0_5 = arith.constant 0 : index
    %c0_6 = arith.constant 0 : index
    %3 = vector.load %arg8[%c0_5, %c0_6] : memref<3x9xf32, #tpu.memory_space<vmem>>, vector<3x9xf32>
    %c0_7 = arith.constant 0 : index
    %c0_8 = arith.constant 0 : index
    %4 = vector.load %arg3[%c0_7, %c0_8] : memref<9x1xf32, #tpu.memory_space<vmem>>, vector<9x1xf32>
    %c0_9 = arith.constant 0 : index
    %c0_10 = arith.constant 0 : index
    %5 = vector.load %arg5[%c0_9, %c0_10] : memref<9x1xf32, #tpu.memory_space<vmem>>, vector<9x1xf32>
    %c0_11 = arith.constant 0 : index
    %c0_12 = arith.constant 0 : index
    %6 = vector.load %arg7[%c0_11, %c0_12] : memref<9x1xf32, #tpu.memory_space<vmem>>, vector<9x1xf32>
    %c0_13 = arith.constant 0 : index
    %c0_14 = arith.constant 0 : index
    %7 = vector.load %arg9[%c0_13, %c0_14] : memref<3x1xf32, #tpu.memory_space<vmem>>, vector<3x1xf32>
    %c0_i32 = arith.constant 0 : i32
    %c128_i32 = arith.constant 128 : i32
    %8 = arith.muli %c0_i32, %c128_i32 : i32
    %9 = tpu.assume_multiple %8, 128 : i32
    %10 = arith.index_cast %9 : i32 to index
    %c0_15 = arith.constant 0 : index
    %11 = vector.load %arg1[%10, %c0_15] : memref<128x16xf32, #tpu.memory_space<vmem>>, vector<128x16xf32>
    %cst = arith.constant dense<0.000000e+00> : vector<9x128xf32>
    %12 = tpu.matmul %0, %11, %cst {dimension_numbers = #tpu.dot_dimension_numbers<[1], [1], [0], [0], [0, 0, 1, 0], [], []>} : vector<9x16xf32>, vector<128x16xf32>, vector<9x128xf32> -> vector<9x128xf32>
    %13 = vector.broadcast %4 : vector<9x1xf32> to vector<9x128xf32>
    %14 = arith.addf %12, %13 : vector<9x128xf32>
    %cst_16 = arith.constant 0.000000e+00 : f32
    %15 = vector.broadcast %cst_16 : f32 to vector<9x128xf32>
    %16 = arith.cmpf oge, %14, %15 : vector<9x128xf32>
    %cst_17 = arith.constant 0.00999999977 : f32
    %17 = vector.broadcast %cst_17 : f32 to vector<9x128xf32>
    %18 = arith.mulf %17, %14 : vector<9x128xf32>
    %19 = arith.select %16, %14, %18 : vector<9x128xi1>, vector<9x128xf32>
    %cst_18 = arith.constant dense<0.000000e+00> : vector<9x128xf32>
    %20 = tpu.matmul %1, %19, %cst_18 {dimension_numbers = #tpu.dot_dimension_numbers<[1], [0], [0], [1], [0, 0, 1, 1], [], []>} : vector<9x9xf32>, vector<9x128xf32>, vector<9x128xf32> -> vector<9x128xf32>
    %21 = vector.broadcast %5 : vector<9x1xf32> to vector<9x128xf32>
    %22 = arith.addf %20, %21 : vector<9x128xf32>
    %cst_19 = arith.constant 0.000000e+00 : f32
    %23 = vector.broadcast %cst_19 : f32 to vector<9x128xf32>
    %24 = arith.cmpf oge, %22, %23 : vector<9x128xf32>
    %cst_20 = arith.constant 0.00999999977 : f32
    %25 = vector.broadcast %cst_20 : f32 to vector<9x128xf32>
    %26 = arith.mulf %25, %22 : vector<9x128xf32>
    %27 = arith.select %24, %22, %26 : vector<9x128xi1>, vector<9x128xf32>
    %cst_21 = arith.constant dense<0.000000e+00> : vector<9x128xf32>
    %28 = tpu.matmul %2, %27, %cst_21 {dimension_numbers = #tpu.dot_dimension_numbers<[1], [0], [0], [1], [0, 0, 1, 1], [], []>} : vector<9x9xf32>, vector<9x128xf32>, vector<9x128xf32> -> vector<9x128xf32>
    %29 = vector.broadcast %6 : vector<9x1xf32> to vector<9x128xf32>
    %30 = arith.addf %28, %29 : vector<9x128xf32>
    %cst_22 = arith.constant 0.000000e+00 : f32
    %31 = vector.broadcast %cst_22 : f32 to vector<9x128xf32>
    %32 = arith.cmpf oge, %30, %31 : vector<9x128xf32>
    %cst_23 = arith.constant 0.00999999977 : f32
    %33 = vector.broadcast %cst_23 : f32 to vector<9x128xf32>
    %34 = arith.mulf %33, %30 : vector<9x128xf32>
    %35 = arith.select %32, %30, %34 : vector<9x128xi1>, vector<9x128xf32>
    %cst_24 = arith.constant dense<0.000000e+00> : vector<3x128xf32>
    %36 = tpu.matmul %3, %35, %cst_24 {dimension_numbers = #tpu.dot_dimension_numbers<[1], [0], [0], [1], [0, 0, 1, 1], [], []>} : vector<3x9xf32>, vector<9x128xf32>, vector<3x128xf32> -> vector<3x128xf32>
    %37 = vector.broadcast %7 : vector<3x1xf32> to vector<3x128xf32>
    %38 = arith.addf %36, %37 : vector<3x128xf32>
    %cst_25 = arith.constant 0.000000e+00 : f32
    %39 = vector.broadcast %cst_25 : f32 to vector<3x128xf32>
    %40 = arith.cmpf oge, %38, %39 : vector<3x128xf32>
    %cst_26 = arith.constant 0.00999999977 : f32
    %41 = vector.broadcast %cst_26 : f32 to vector<3x128xf32>
    %42 = arith.mulf %41, %38 : vector<3x128xf32>
    %43 = arith.select %40, %38, %42 : vector<3x128xi1>, vector<3x128xf32>
    %c0_27 = arith.constant 0 : index
    %44 = arith.index_cast %9 : i32 to index
    %45 = vector.load %arg10[%c0_27, %44] : memref<3x128xf32, #tpu.memory_space<vmem>>, vector<3x128xf32>
    tpu.vector_store %arg10[%c0_27, %44], %43 {strides = array<i32>} : memref<3x128xf32, #tpu.memory_space<vmem>>, vector<3x128xf32>,
    %c1_i32 = arith.constant 1 : i32
    return
  }
  func.func @transform_0(%arg0: i32) -> (i32, i32) {
    %c0_i32 = arith.constant 0 : i32
    %c0_i32_0 = arith.constant 0 : i32
    return %arg0, %c0_i32 : i32, i32
  }
  func.func @transform_1(%arg0: i32) -> (i32, i32) {
    %c0_i32 = arith.constant 0 : i32
    %c0_i32_0 = arith.constant 0 : i32
    %c0_i32_1 = arith.constant 0 : i32
    return %c0_i32, %c0_i32_0 : i32, i32
  }
  func.func @transform_2(%arg0: i32) -> (i32, i32) {
    %c0_i32 = arith.constant 0 : i32
    %c0_i32_0 = arith.constant 0 : i32
    %c0_i32_1 = arith.constant 0 : i32
    return %c0_i32, %c0_i32_0 : i32, i32
  }
  func.func @transform_3(%arg0: i32) -> (i32, i32) {
    %c0_i32 = arith.constant 0 : i32
    %c0_i32_0 = arith.constant 0 : i32
    %c0_i32_1 = arith.constant 0 : i32
    return %c0_i32, %c0_i32_0 : i32, i32
  }
  func.func @transform_4(%arg0: i32) -> (i32, i32) {
    %c0_i32 = arith.constant 0 : i32
    %c0_i32_0 = arith.constant 0 : i32
    %c0_i32_1 = arith.constant 0 : i32
    return %c0_i32, %c0_i32_0 : i32, i32
  }
  func.func @transform_5(%arg0: i32) -> (i32, i32) {
    %c0_i32 = arith.constant 0 : i32
    %c0_i32_0 = arith.constant 0 : i32
    %c0_i32_1 = arith.constant 0 : i32
    return %c0_i32, %c0_i32_0 : i32, i32
  }
  func.func @transform_6(%arg0: i32) -> (i32, i32) {
    %c0_i32 = arith.constant 0 : i32
    %c0_i32_0 = arith.constant 0 : i32
    %c0_i32_1 = arith.constant 0 : i32
    return %c0_i32, %c0_i32_0 : i32, i32
  }
  func.func @transform_7(%arg0: i32) -> (i32, i32) {
    %c0_i32 = arith.constant 0 : i32
    %c0_i32_0 = arith.constant 0 : i32
    %c0_i32_1 = arith.constant 0 : i32
    return %c0_i32, %c0_i32_0 : i32, i32
  }
  func.func @transform_8(%arg0: i32) -> (i32, i32) {
    %c0_i32 = arith.constant 0 : i32
    %c0_i32_0 = arith.constant 0 : i32
    %c0_i32_1 = arith.constant 0 : i32
    return %c0_i32, %c0_i32_0 : i32, i32
  }
  func.func @transform_9(%arg0: i32) -> (i32, i32) {
    %c0_i32 = arith.constant 0 : i32
    %c0_i32_0 = arith.constant 0 : i32
    return %c0_i32, %arg0 : i32, i32
  }
}

</mosaic_0001>

<bundles_post_ra>
// kernel: xmor_forward.1
= control target key start
LH: loop header
LB: loop body
LE: loop exit
PB: predicated region body
PF: predicated region fallthrough
CT: control target
= control target key end

     0   :  { %vm73_vm0 = vcmask 130048   ;;  %v717_v6 = vmov 0   ;;  %s934_s0 = inlined_call_operand.vmem [shape: f32[8,16], index: 0, kind: input, shape index: {}]   ;;  %s935_s1 = inlined_call_operand.vmem [shape: f32[9,16], index: 1, kind: input, shape index: {}]   ;;  %s936_s2 = inlined_call_operand.vmem [shape: f32[9,1], index: 2, kind: input, shape index: {}]   ;;  %s937_s3 = inlined_call_operand.vmem [shape: f32[9,9], index: 3, kind: input, shape index: {}]   ;;  %s938_s4 = inlined_call_operand.vmem [shape: f32[9,1], index: 4, kind: input, shape index: {}]   ;;  %s939_s5 = inlined_call_operand.vmem [shape: f32[9,9], index: 5, kind: input, shape index: {}]   ;;  %s940_s6 = inlined_call_operand.vmem [shape: f32[9,1], index: 6, kind: input, shape index: {}]   ;;  %s941_s7 = inlined_call_operand.vmem [shape: f32[3,9], index: 7, kind: input, shape index: {}]   ;;  %s942_s8 = inlined_call_operand.vmem [shape: f32[3,1], index: 8, kind: input, shape index: {}]   ;;  %s943_s9 = inlined_call_operand.hbm [shape: f32[3,8], index: 9, kind: output, shape index: {}]  }
   0x1   :  { %v47_v0 = vld [vmem:[%s934_s0] sm:$0xff]  ;;  %v48_v1 = vld [vmem:[%s934_s0 + $0x8] sm:$0xff]  ;;  %v49_v2 = vld [vmem:[%s934_s0 + $0x10] sm:$0xff]  ;;  %691 = vset.pattern.permute.xlu0 %v717_v6  ;;  %692 = vset.pattern.permute.xlu1 %v717_v6 }
   0x2   :  { %v621_v3 = vpack.c.bf16 %v48_v1, %v47_v0  ;;  %vm784_vm1 = vmpackc.low %vm73_vm0, %vm73_vm0  ;;  %v50_v5 = vld [vmem:[%s934_s0 + $0x18] sm:$0xff]  ;;  %v33_v8 = vld [vmem:[%s935_s1] sm:$0xff] }
   0x3   :  { %v627_v7 = vpack.c.bf16 %v50_v5, %v49_v2  ;;  %v51_v9 = vld [vmem:[%s934_s0 + $0x20] sm:$0xff]  ;;  %v52_v10 = vld [vmem:[%s934_s0 + $0x28] sm:$0xff]  ;;  %597 = vmatprep.mubr.msk.f32.mxu0 %vm73_vm0, %v33_v8 }
   0x4   :  { %623 = vmatprep.subr.msk.bf16.mxu0 %vm784_vm1, %v621_v3  ;;  %v40_v11 = vld [vmem:[%s936_s2] sm:$0xff] }
   0x5   :  { %626 = vmatpush3.bf16.xpose.msk.msra.mxu0 %vm784_vm1, %v621_v3  ;;  %65 = vperm.xlu0 %691, %v40_v11  }
   0x6   :  { %629 = vmatprep.subr.msk.bf16.mxu0 %vm784_vm1, %v627_v7 }
   0x7   :  { %14 = vsyncpa [#allocation3], 0  ;;  %v41_v12 = vld [vmem:[%s936_s2 + $0x8] sm:$0x1]  ;;  %v633_v13 = vpack.c.bf16 %v52_v10, %v51_v9  ;;  %v44_v14 = vld [vmem:[%s940_s6] sm:$0xff]  ;;  %vm219_vm2 = vcmask 72704  }
   0x8   :  { %v53_v15 = vld [vmem:[%s934_s0 + $0x30] sm:$0xff]  ;;  %v54_v16 = vld [vmem:[%s934_s0 + $0x38] sm:$0xff]  ;;  %v46_v17 = vld [vmem:[%s942_s8] sm:$0x7]  ;;  %vm226_vm4 = vcmask 1040384   ;;  %vm718_vm6 = vmmov 1  }
   0x9   :  { %70 = vperm.xlu0 %691, %v41_v12   ;;  %v639_v18 = vpack.c.bf16 %v54_v16, %v53_v15  ;;  %v55_v19 = vld [vmem:[%s934_s0 + $0x40] sm:$0xff]  ;;  %v56_v20 = vld [vmem:[%s934_s0 + $0x48] sm:$0xff]  ;;  %v57_v22 = vld [vmem:[%s934_s0 + $0x50] sm:$0xff]  ;;  %v719_v62 = vmov 0.0|0.0   ;;  %vm720_vm10 = vmmov 0   ;;  %v721_v63 = vmov 0.0  }
   0xa   :  { %v645_v21 = vpack.c.bf16 %v56_v20, %v55_v19  ;;  %v58_v23 = vld [vmem:[%s934_s0 + $0x58] sm:$0xff]  ;;  %v59_v25 = vld [vmem:[%s934_s0 + $0x60] sm:$0xff]  ;;  %v60_v26 = vld [vmem:[%s934_s0 + $0x68] sm:$0xff]  ;;  %s722_s17 = smov [#allocation2]  }
   0xb   :  { %v651_v24 = vpack.c.bf16 %v58_v23, %v57_v22  ;;  %v657_v27 = vpack.c.bf16 %v60_v26, %v59_v25  ;;  %v61_v28 = vld [vmem:[%s934_s0 + $0x70] sm:$0xff]  ;;  %v62_v29 = vld [vmem:[%s934_s0 + $0x78] sm:$0xff]  ;;  %v34_v31 = vld [vmem:[%s935_s1 + $0x8] sm:$0x1]  ;;  %s502_s18 = sshll.u32 %s722_s17, 4  ;;  %s503_s18 = int_to_ptr.vmem [resolvable:$true] %s502_s18 }
   0xc   :  { %v663_v30 = vpack.c.bf16 %v62_v29, %v61_v28  ;;  %v35_v32 = vld [vmem:[%s937_s3] sm:$0xff]  ;;  %v43_v34 = vld [vmem:[%s938_s4 + $0x8] sm:$0x1]  ;;  %vm892_vm7 = vmpackc.low %vm226_vm4, %vm718_vm6  ;;  %s693_s19 = scalar_lea.vmem %s503_s18, 64  ;;  %p698_p1 = scmp.lt.s32.totalorder %s503_s18, %s503_s18 }
   0xd   :  { %632 = vmatpush3.bf16.xpose.msk.msra.mxu0 %vm784_vm1, %v627_v7  ;;  %313 = vperm.xlu0 %691, %v44_v14   ;;  %v42_v33 = vld [vmem:[%s938_s4] sm:$0xff]  ;;  %v45_v35 = vld [vmem:[%s940_s6 + $0x8] sm:$0x1]  ;;  %p694_p0 = scmp.ne.s32.totalorder %s503_s18, %s693_s19  ;;  %p699_p2 = scmp.lt.s32.totalorder %s693_s19, %s693_s19 }
   0xe   :  { %635 = vmatprep.subr.msk.bf16.mxu0 %vm784_vm1, %v633_v13  ;;  %604 = vmatprep.mubr.msk.f32.mxu1 %vm219_vm2, %v35_v32  ;;  %v36_v48 = vld [vmem:[%s937_s3 + $0x8] sm:$0x1]  ;;  %v37_v49 = vld [vmem:[%s939_s5] sm:$0xff] }
   0xf   :  { %211 = vperm.xlu1 %692, %v42_v33   ;;  %v38_v61 = vld [vmem:[%s939_s5 + $0x8] sm:$0x1]  ;;  %v39_v11 = vld [vmem:[%s941_s7] sm:$0x7]  ;;  %p700_p3 = por %p699_p2, %p698_p1 }
  0x11   :  { %413 = vperm.xlu0 %691, %v46_v17   ;;  %p701_p4 = pnand %p700_p3, %p694_p0 }
  0x13   :  { %216 = vperm.xlu1 %692, %v43_v34  }
  0x15   :  { %638 = vmatpush3.bf16.xpose.msk.msra.mxu0 %vm784_vm1, %v633_v13 }
  0x16   :  { %641 = vmatprep.subr.msk.bf16.mxu0 %vm784_vm1, %v639_v18 }
  0x17   :  { %318 = vperm.xlu1 %692, %v45_v35  }
  0x1d   :  { %644 = vmatpush3.bf16.xpose.msk.msra.mxu0 %vm784_vm1, %v639_v18 }
  0x1e   :  { %647 = vmatprep.subr.msk.bf16.mxu0 %vm784_vm1, %v645_v21 }
  0x25   :  { %650 = vmatpush3.bf16.xpose.msk.msra.mxu0 %vm784_vm1, %v645_v21 }
  0x26   :  { %653 = vmatprep.subr.msk.bf16.mxu0 %vm784_vm1, %v651_v24 }
  0x2d   :  { %656 = vmatpush3.bf16.xpose.msk.msra.mxu0 %vm784_vm1, %v651_v24 }
  0x2e   :  { %659 = vmatprep.subr.msk.bf16.mxu0 %vm784_vm1, %v657_v27 }
  0x35   :  { %662 = vmatpush3.bf16.xpose.msk.msra.mxu0 %vm784_vm1, %v657_v27 }
  0x36   :  { %665 = vmatprep.subr.msk.bf16.mxu0 %vm784_vm1, %v663_v30 }
  0x3d   :  { %668 = vmatpush3.bf16.xpose.msk.msra.mxu0 %vm784_vm1, %v663_v30 }
  0x44   :  { %598 = vmatmul.mubr.msk.f32.vlgmr.msra.gmra.mrb[0].mxu0 %vm73_vm0, %v34_v31 }
  0x84   :  { %v66_v36 = vpop.permute.xlu0 %65 }
  0x88   :  { %v71_v37 = vpop.permute.xlu0 %70 }
  0x8c   :  { %v314_v2 = vpop.permute.xlu0 %313 }
  0x8e   :  { %v212_v50 = vpop.permute.xlu1 %211 }
  0x90   :  { %v414_v12 = vpop.permute.xlu0 %413 }
  0x92   :  { %v217_v51 = vpop.permute.xlu1 %216 }
  0x96   :  { %v319_v0 = vpop.permute.xlu1 %318 }
 0x117   :  { %v599_v38 = vpop.f32.mrb[0].mxu0 }
 0x118   :  { %v200_v39 = vadd.f32 %v599_v38, %v71_v37  ;;  %v194_v40 = vpop.f32.mrb[1].mxu0 }
 0x119   :  { %v195_v41 = vadd.f32 %v194_v40, %v66_v36 }
 0x11a   :  { %v206_v42 = vmul.f32 0.01, %v200_v39  ;;  %vm204_vm3 = vcmp.ge.f32.partialorder %v200_v39, 0.0 }
 0x11b   :  { %v205_v43 = vmul.f32 0.01, %v195_v41  ;;  %vm203_vm5 = vcmp.ge.f32.partialorder %v195_v41, 0.0 }
 0x11c   :  { %v208_v44 = vsel %vm204_vm3, %v200_v39, %v206_v42 }
 0x11d   :  { %v207_v45 = vsel %vm203_vm5, %v195_v41, %v205_v43 }
 0x11e   :  { %v669_v47 = vpack.c.bf16 %v208_v44, %v207_v45 }
 0x120   :  { %671 = vmatprep.subr.msk.bf16.mxu1 %vm892_vm7, %v669_v47 }
 0x121   :  { %674 = vmatpush3.bf16.msk.msra.mxu1 %vm892_vm7, %v669_v47 }
 0x124   :  { %605 = vmatmul.mubr.msk.f32.vlgmr.msra.gmra.mrb[0].mxu1 %vm219_vm2, %v36_v48 }
 0x125   :  { %611 = vmatprep.mubr.msk.f32.mxu1 %vm219_vm2, %v37_v49 }
 0x1f7   :  { %v606_v52 = vpop.f32.mrb[0].mxu1 }
 0x1f8   :  { %v302_v53 = vadd.f32 %v606_v52, %v217_v51  ;;  %v296_v54 = vpop.f32.mrb[1].mxu1 }
 0x1f9   :  { %v297_v55 = vadd.f32 %v296_v54, %v212_v50 }
 0x1fa   :  { %vm306_vm8 = vcmp.ge.f32.partialorder %v302_v53, 0.0  ;;  %v308_v56 = vmul.f32 0.01, %v302_v53 }
 0x1fb   :  { %vm305_vm9 = vcmp.ge.f32.partialorder %v297_v55, 0.0  ;;  %v307_v57 = vmul.f32 0.01, %v297_v55 }
 0x1fc   :  { %v310_v58 = vsel %vm306_vm8, %v302_v53, %v308_v56 }
 0x1fd   :  { %v309_v59 = vsel %vm305_vm9, %v297_v55, %v307_v57 }
 0x1fe   :  { %v675_v60 = vpack.c.bf16 %v310_v58, %v309_v59 }
 0x200   :  { %677 = vmatprep.subr.msk.bf16.mxu1 %vm892_vm7, %v675_v60 }
 0x201   :  { %680 = vmatpush3.bf16.msk.msra.mxu1 %vm892_vm7, %v675_v60 }
 0x202   :  { %681 = vmatprep.subr.bf16.mxu1 %v719_v62 }
 0x204   :  { %612 = vmatmul.mubr.msk.f32.vlgmr.msra.gmra.mrb[2].mxu1 %vm219_vm2, %v38_v61 }
 0x205   :  { %618 = vmatprep.mubr.msk.f32.mxu1 %vm720_vm10, %v721_v63 }
 0x2d7   :  { %v613_v1 = vpop.f32.mrb[2].mxu1 }
 0x2d8   :  { %v402_v3 = vadd.f32 %v613_v1, %v319_v0  ;;  %v396_v4 = vpop.f32.mrb[3].mxu1 }
 0x2d9   :  { %v397_v5 = vadd.f32 %v396_v4, %v314_v2 }
 0x2da   :  { %vm406_vm11 = vcmp.ge.f32.partialorder %v402_v3, 0.0  ;;  %v408_v6 = vmul.f32 0.01, %v402_v3 }
 0x2db   :  { %vm405_vm12 = vcmp.ge.f32.partialorder %v397_v5, 0.0  ;;  %v407_v7 = vmul.f32 0.01, %v397_v5 }
 0x2dc   :  { %v410_v8 = vsel %vm406_vm11, %v402_v3, %v408_v6 }
 0x2dd   :  { %v409_v9 = vsel %vm405_vm12, %v397_v5, %v407_v7 }
 0x2de   :  { %v682_v10 = vpack.c.bf16 %v410_v8, %v409_v9 }
 0x2e0   :  { %684 = vmatpush3.bf16.msk.msra.mxu1 %vm892_vm7, %v682_v10 }
 0x2e3   :  { %619 = vmatmul.mubr.msk.f32.vlgmr.msra.gmra.mrb[4].mxu1 %vm219_vm2, %v39_v11 }
 0x3b6   :  { %v488_v13 = vpop.f32.mrb[4].mxu1 }
 0x3b7   :  { %v489_v14 = vadd.f32 %v488_v13, %v414_v12  ;;  %v620_v15 = vpop.f32.mrb[5].mxu1 }
 0x3b9   :  { %v493_v16 = vmul.f32 0.01, %v489_v14  ;;  %vm492_vm13 = vcmp.ge.f32.partialorder %v489_v14, 0.0 }
 0x3bb   :  { %v494_v17 = vsel %vm492_vm13, %v489_v14, %v493_v16 }
 0x3bc   :  { %495 = vst [vmem:[#allocation2] sm:$0x7] %v494_v17 }
 0x3bd   :  { %704 = shalt.err (!%p701_p4)
}
 0x3be   :  { %s705_s21 = scalar_lea.hbm %s943_s9, 64 }
 0x3bf   :  { %p706_p5 = scmp.ne.s32.totalorder %s943_s9, %s705_s21  ;;  %p709_p6 = scmp.lt.u32.totalorder %s705_s21, %s943_s9 }
 0x3c1   :  { %p711_p7 = pnand %p709_p6, %p706_p5 }
 0x3c3   :  { %714 = shalt.err (!%p711_p7)
}
 0x3c4   :  { %505 = dma.vmem_to_hbm [thread:$0]  %s503_s18, 64, %s943_s9, [#allocation3]  }
 0x3c5   :  { %715 = dma.done.wait [#allocation3], 64  }
 0x3c6   :  { %716 = vsyncadd [#allocation3], 4294967232 }
 0x3c7   :  { %509 = vsyncpa [#allocation3], 1 }

</bundles_post_ra>
